<compile_context>
chip_gen: v6e
topology: v6e:2x2x1
jax: 0.10.0
libtpu: 0.0.40
codegen_flags: <defaults>
</compile_context>

<pallas_src>
import functools
import math

import jax
import jax.numpy as jnp
from jax.experimental import pallas as pl
from jax.experimental.pallas import tpu as pltpu


# ---------------- Pallas kernel ----------------

def _timestep_embed_kernel(ts_ref, pe_ref, w1_ref, b1_ref, w2_ref, b2_ref,
                           o_ref, x_ref, sem):
    """Gather pe rows + fused Linear -> SiLU -> Linear on one [TM, D] tile.

    ts_ref: [M] int32 in SMEM (scalar-prefetched timesteps)
    pe_ref: [max_len, 1, D] raw HBM ref (memory_space=pl.ANY)
    w1/w2 : [D, D] resident VMEM tiles (any dtype, upcast to f32 in-register)
    b1/b2 : [1, D] fp32
    x_ref : [TM, D] fp32 VMEM scratch (gather destination)
    sem   : scalar DMA semaphore shared by the per-row gather copies
    """
    i = pl.program_id(0)
    tm = x_ref.shape[0]
    m_total = ts_ref.shape[0]
    base = i * tm

    # --- per-row gather: pe[ts[base+r], 0, :] -> x_ref[r, :] ----------------
    # Start all row DMAs first so they overlap, then wait for all of them.
    # Rows past the end of the batch (partial last tile) are clamped to the
    # last valid timestep; their outputs are never written back by Pallas.
    def start_row(r, carry):
        g = jnp.minimum(base + r, m_total - 1)
        t = ts_ref[g]
        pltpu.make_async_copy(pe_ref.at[t], x_ref.at[pl.ds(r, 1), :], sem).start()
        return carry

    jax.lax.fori_loop(0, tm, start_row, 0)

    def wait_row(r, carry):
        # Source index is irrelevant for the wait; only shape/bytes + sem matter.
        pltpu.make_async_copy(pe_ref.at[0], x_ref.at[pl.ds(r, 1), :], sem).wait()
        return carry

    jax.lax.fori_loop(0, tm, wait_row, 0)

    # --- fused MLP: fp32 activations, fp32 MXU accumulation -----------------
    x = x_ref[...]                                     # [TM, D] fp32
    w1 = w1_ref[...].astype(jnp.float32)               # bf16-stored -> f32 regs
    h = jnp.dot(x, w1, preferred_element_type=jnp.float32) + b1_ref[...]
    h = h * jax.nn.sigmoid(h)                          # SiLU (EUP/VPU filler)
    w2 = w2_ref[...].astype(jnp.float32)
    y = jnp.dot(h, w2, preferred_element_type=jnp.float32) + b2_ref[...]
    o_ref[...] = y.astype(o_ref.dtype)


def timestep_embedder(pe, timesteps, w1, b1, w2, b2, *, tm=512,
                      out_dtype=jnp.float32):
    """
    pe:        [max_len, 1, D] float32 positional-encoding buffer (stays in HBM)
    timesteps: [bs] integer timesteps (scalar-prefetched into SMEM)
    w1, b1:    [D, D], [D]   time_embed[0]  (weights already [in, out]; any dtype,
    w2, b2:    [D, D], [D]   time_embed[2]   e.g. pre-cast to bf16 at setup)
    returns:   [1, bs, D]    (matches .permute(1, 0, 2) of [bs, 1, D])
    """
    max_len, _, D = pe.shape
    M = timesteps.shape[0]

    tm_eff = M if M <= tm else tm            # full block for tiny M, else row tiles
    num_tiles = pl.cdiv(M, tm_eff)

    ts = timesteps.astype(jnp.int32)
    b1r = b1.reshape(1, D).astype(jnp.float32)
    b2r = b2.reshape(1, D).astype(jnp.float32)

    # Megacore only pays off when each core gets a full tile of rows;
    # otherwise it duplicates the resident weight DMA (or does nothing).
    dims = ("parallel",) if M >= 2 * tm_eff else ("arbitrary",)

    cost = pl.CostEstimate(
        flops=4 * M * D * D,                                  # two D x D matmuls
        transcendentals=M * D,                                # sigmoid
        bytes_accessed=(w1.size * w1.dtype.itemsize
                        + w2.size * w2.dtype.itemsize
                        + b1r.size * 4 + b2r.size * 4
                        + M * D * pe.dtype.itemsize           # gathered rows
                        + M * D * jnp.dtype(out_dtype).itemsize),  # output
    )

    grid_spec = pltpu.PrefetchScalarGridSpec(
        num_scalar_prefetch=1,                                # timesteps -> SMEM
        grid=(num_tiles,),
        in_specs=[
            pl.BlockSpec(memory_space=pl.ANY),                # pe stays in HBM
            pl.BlockSpec((D, D), lambda i, _ts: (0, 0)),      # W1 resident
            pl.BlockSpec((1, D), lambda i, _ts: (0, 0)),      # b1 resident
            pl.BlockSpec((D, D), lambda i, _ts: (0, 0)),      # W2 resident
            pl.BlockSpec((1, D), lambda i, _ts: (0, 0)),      # b2 resident
        ],
        out_specs=pl.BlockSpec((tm_eff, D), lambda i, _ts: (i, 0)),
        scratch_shapes=[
            pltpu.VMEM((tm_eff, D), jnp.float32),             # gathered x tile
            pltpu.SemaphoreType.DMA(()),                      # gather semaphore
        ],
    )

    out2d = pl.pallas_call(
        _timestep_embed_kernel,
        out_shape=jax.ShapeDtypeStruct((M, D), out_dtype),
        grid_spec=grid_spec,
        compiler_params=pltpu.CompilerParams(
            dimension_semantics=dims,
            vmem_limit_bytes=32 * 1024 * 1024,                # fits v5e/v6e/v7x
        ),
        cost_estimate=cost,
    )(ts, pe, w1, b1r, w2, b2r)

    # [bs, 1, D].permute(1, 0, 2) -> [1, bs, D]
    return out2d.reshape(1, M, D)


# ---------------- pure-JAX reference & setup ----------------

def timestep_embedder_ref(pe, timesteps, w1, b1, w2, b2):
    hp = jax.lax.Precision.HIGHEST
    t = pe[:, 0, :][timesteps]                      # [bs, D]
    h = jnp.dot(t, w1, precision=hp) + b1
    h = h * jax.nn.sigmoid(h)                       # SiLU
    y = jnp.dot(h, w2, precision=hp) + b2
    return y.reshape(1, timesteps.shape[0], -1)


def make_positional_encoding(d_model, max_len=5000):
    position = jnp.arange(max_len, dtype=jnp.float32)[:, None]
    div_term = jnp.exp(jnp.arange(0, d_model, 2, dtype=jnp.float32)
                       * (-math.log(10000.0) / d_model))
    pe = jnp.zeros((max_len, d_model), dtype=jnp.float32)
    pe = pe.at[:, 0::2].set(jnp.sin(position * div_term))
    pe = pe.at[:, 1::2].set(jnp.cos(position * div_term))
    return pe[:, None, :]                           # [max_len, 1, d_model]


if __name__ == "__main__":
    latent_dim = 128        # lane-dense (multiple of 128)
    max_len = 5000
    bs = 8                  # sublane-aligned batch

    key = jax.random.PRNGKey(0)
    k_t, k_w1, k_b1, k_w2, k_b2 = jax.random.split(key, 5)

    pe = make_positional_encoding(latent_dim, max_len)
    timesteps = jax.random.randint(k_t, (bs,), 0, 1000, dtype=jnp.int32)

    bound = 1.0 / math.sqrt(latent_dim)             # torch nn.Linear default init
    w1_f32 = jax.random.uniform(k_w1, (latent_dim, latent_dim), jnp.float32, -bound, bound)
    b1 = jax.random.uniform(k_b1, (latent_dim,), jnp.float32, -bound, bound)
    w2_f32 = jax.random.uniform(k_w2, (latent_dim, latent_dim), jnp.float32, -bound, bound)
    b2 = jax.random.uniform(k_b2, (latent_dim,), jnp.float32, -bound, bound)

    # Setup-time (once) bf16 storage of the matmul weights; the forward path
    # itself contains no casts.  Pass w*_f32 instead for bit-exact fp32 params.
    w1 = w1_f32.astype(jnp.bfloat16)
    w2 = w2_f32.astype(jnp.bfloat16)

    fwd = jax.jit(functools.partial(timestep_embedder, tm=512))
    out = fwd(pe, timesteps, w1, b1, w2, b2)
    jax.block_until_ready(out)

    # Reference uses the same (bf16-stored) weights upcast to fp32, so the
    # check isolates kernel math; fp32 activations in-kernel keep it tight.
    ref = timestep_embedder_ref(pe, timesteps,
                                w1.astype(jnp.float32), b1,
                                w2.astype(jnp.float32), b2)

    assert out.shape == (1, bs, latent_dim), out.shape
    assert bool(jnp.all(jnp.isfinite(out)))
    max_err = float(jnp.max(jnp.abs(out - ref)))
    assert bool(jnp.allclose(out, ref, rtol=2e-3, atol=2e-3)), max_err
    print("KERNEL_OK")
</pallas_src>

<mosaic_0001>
module attributes {stable_mosaic.version = 11 : i64} {
  func.func @_timestep_embed_kernel(%arg0: i32, %arg1: memref<8xi32, #tpu.memory_space<smem>>, %arg2: memref<5000x1x128xf32, #tpu.memory_space<any>>, %arg3: memref<128x128xbf16, #tpu.memory_space<vmem>>, %arg4: memref<1x128xf32, #tpu.memory_space<vmem>>, %arg5: memref<128x128xbf16, #tpu.memory_space<vmem>>, %arg6: memref<1x128xf32, #tpu.memory_space<vmem>>, %arg7: memref<8x128xf32, #tpu.memory_space<vmem>>, %arg8: memref<8x128xf32, #tpu.memory_space<vmem>>, %arg9: memref<!tpu.dma_semaphore, #tpu.memory_space<semaphore_mem>>) attributes {dimension_semantics = [#tpu.dimension_semantics<arbitrary>], iteration_bounds = array<i64: 1>, scalar_prefetch = 1 : i64, scratch_operands = 2 : i64, tpu.core_type = #tpu.core_type<tc>, window_params = [{}, {pipeline_mode = #tpu.pipeline_mode<synchronous>, transform_indices = @transform_1, window_bounds = array<i64: 128, 128>}, {pipeline_mode = #tpu.pipeline_mode<synchronous>, transform_indices = @transform_2, window_bounds = array<i64: 1, 128>}, {pipeline_mode = #tpu.pipeline_mode<synchronous>, transform_indices = @transform_3, window_bounds = array<i64: 128, 128>}, {pipeline_mode = #tpu.pipeline_mode<synchronous>, transform_indices = @transform_4, window_bounds = array<i64: 1, 128>}, {transform_indices = @transform_5, window_bounds = array<i64: 8, 128>}]} {
    %c8_i32 = arith.constant 8 : i32
    %0 = arith.muli %arg0, %c8_i32 : i32
    %c0_i32 = arith.constant 0 : i32
    %c8_i32_0 = arith.constant 8 : i32
    %1 = arith.addi %c0_i32, %c8_i32_0 : i32
    %c1_i32 = arith.constant 1 : i32
    scf.for %arg10 = %c0_i32 to %1 step %c1_i32  : i32 {
      %23 = arith.addi %0, %arg10 : i32
      %c7_i32 = arith.constant 7 : i32
      %24 = arith.minsi %23, %c7_i32 : i32
      %25 = arith.index_cast %24 : i32 to index
      %26 = memref.load %arg1[%25] : memref<8xi32, #tpu.memory_space<smem>>
      %c0_i32_19 = arith.constant 0 : i32
      %c0_i32_20 = arith.constant 0 : i32
      %27 = tpu.memref_slice %arg2[%26, %c0_i32_19, %c0_i32_20] : memref<5000x1x128xf32, #tpu.memory_space<any>> -> memref<1x1x128xf32, #tpu.memory_space<any>>
      %28 = tpu.memref_squeeze %27 : memref<1x1x128xf32, #tpu.memory_space<any>> -> memref<1x128xf32, #tpu.memory_space<any>>
      %c0_i32_21 = arith.constant 0 : i32
      %29 = tpu.memref_slice %arg8[%arg10, %c0_i32_21] : memref<8x128xf32, #tpu.memory_space<vmem>> -> memref<1x128xf32, #tpu.memory_space<vmem>>
      tpu.enqueue_dma source(%28 : memref<1x128xf32, #tpu.memory_space<any>>) target(%29 : memref<1x128xf32, #tpu.memory_space<vmem>>) target_semaphore(%arg9 : memref<!tpu.dma_semaphore, #tpu.memory_space<semaphore_mem>>)
    }
    %c8_i32_1 = arith.constant 8 : i32
    %c0_i32_2 = arith.constant 0 : i32
    %c8_i32_3 = arith.constant 8 : i32
    %2 = arith.addi %c0_i32_2, %c8_i32_3 : i32
    %c1_i32_4 = arith.constant 1 : i32
    scf.for %arg10 = %c0_i32_2 to %2 step %c1_i32_4  : i32 {
      %c0_i32_19 = arith.constant 0 : i32
      %c0_i32_20 = arith.constant 0 : i32
      %c0_i32_21 = arith.constant 0 : i32
      %23 = tpu.memref_slice %arg2[%c0_i32_19, %c0_i32_20, %c0_i32_21] : memref<5000x1x128xf32, #tpu.memory_space<any>> -> memref<1x1x128xf32, #tpu.memory_space<any>>
      %24 = tpu.memref_squeeze %23 : memref<1x1x128xf32, #tpu.memory_space<any>> -> memref<1x128xf32, #tpu.memory_space<any>>
      %c0_i32_22 = arith.constant 0 : i32
      %25 = tpu.memref_slice %arg8[%arg10, %c0_i32_22] : memref<8x128xf32, #tpu.memory_space<vmem>> -> memref<1x128xf32, #tpu.memory_space<vmem>>
      tpu.wait_dma2 semaphore(%arg9 : memref<!tpu.dma_semaphore, #tpu.memory_space<semaphore_mem>>) src(%24 : memref<1x128xf32, #tpu.memory_space<any>>) dst(%25 : memref<1x128xf32, #tpu.memory_space<vmem>>)
    }
    %c8_i32_5 = arith.constant 8 : i32
    %c0 = arith.constant 0 : index
    %c0_6 = arith.constant 0 : index
    %3 = vector.load %arg8[%c0, %c0_6] : memref<8x128xf32, #tpu.memory_space<vmem>>, vector<8x128xf32>
    %c0_7 = arith.constant 0 : index
    %c0_8 = arith.constant 0 : index
    %4 = vector.load %arg3[%c0_7, %c0_8] : memref<128x128xbf16, #tpu.memory_space<vmem>>, vector<128x128xbf16>
    %5 = arith.extf %4 : vector<128x128xbf16> to vector<128x128xf32>
    %cst = arith.constant dense<0.000000e+00> : vector<8x128xf32>
    %6 = tpu.matmul %3, %5, %cst {dimension_numbers = #tpu.dot_dimension_numbers<[1], [0], [0], [1], [0, 0, 1, 1], [], []>} : vector<8x128xf32>, vector<128x128xf32>, vector<8x128xf32> -> vector<8x128xf32>
    %c0_9 = arith.constant 0 : index
    %c0_10 = arith.constant 0 : index
    %7 = vector.load %arg4[%c0_9, %c0_10] : memref<1x128xf32, #tpu.memory_space<vmem>>, vector<1x128xf32>
    %8 = vector.broadcast %7 : vector<1x128xf32> to vector<8x128xf32>
    %9 = arith.addf %6, %8 : vector<8x128xf32>
    %10 = arith.negf %9 : vector<8x128xf32>
    %11 = math.exp %10 : vector<8x128xf32>
    %cst_11 = arith.constant 1.000000e+00 : f32
    %12 = vector.broadcast %cst_11 : f32 to vector<8x128xf32>
    %13 = arith.addf %12, %11 : vector<8x128xf32>
    %14 = arith.divf %12, %13 : vector<8x128xf32>
    %15 = arith.mulf %9, %14 : vector<8x128xf32>
    %c0_12 = arith.constant 0 : index
    %c0_13 = arith.constant 0 : index
    %16 = vector.load %arg5[%c0_12, %c0_13] : memref<128x128xbf16, #tpu.memory_space<vmem>>, vector<128x128xbf16>
    %17 = arith.extf %16 : vector<128x128xbf16> to vector<128x128xf32>
    %cst_14 = arith.constant dense<0.000000e+00> : vector<8x128xf32>
    %18 = tpu.matmul %15, %17, %cst_14 {dimension_numbers = #tpu.dot_dimension_numbers<[1], [0], [0], [1], [0, 0, 1, 1], [], []>} : vector<8x128xf32>, vector<128x128xf32>, vector<8x128xf32> -> vector<8x128xf32>
    %c0_15 = arith.constant 0 : index
    %c0_16 = arith.constant 0 : index
    %19 = vector.load %arg6[%c0_15, %c0_16] : memref<1x128xf32, #tpu.memory_space<vmem>>, vector<1x128xf32>
    %20 = vector.broadcast %19 : vector<1x128xf32> to vector<8x128xf32>
    %21 = arith.addf %18, %20 : vector<8x128xf32>
    %c0_17 = arith.constant 0 : index
    %c0_18 = arith.constant 0 : index
    %22 = vector.load %arg7[%c0_17, %c0_18] : memref<8x128xf32, #tpu.memory_space<vmem>>, vector<8x128xf32>
    tpu.vector_store %arg7[%c0_17, %c0_18], %21 {strides = array<i32>} : memref<8x128xf32, #tpu.memory_space<vmem>>, vector<8x128xf32>,
    return
  }
  func.func @transform_1(%arg0: i32, %arg1: memref<8xi32, #tpu.memory_space<smem>>) -> (i32, i32) {
    %c0_i32 = arith.constant 0 : i32
    %c0_i32_0 = arith.constant 0 : i32
    %c0_i32_1 = arith.constant 0 : i32
    return %c0_i32, %c0_i32_0 : i32, i32
  }
  func.func @transform_2(%arg0: i32, %arg1: memref<8xi32, #tpu.memory_space<smem>>) -> (i32, i32) {
    %c0_i32 = arith.constant 0 : i32
    %c0_i32_0 = arith.constant 0 : i32
    %c0_i32_1 = arith.constant 0 : i32
    return %c0_i32, %c0_i32_0 : i32, i32
  }
  func.func @transform_3(%arg0: i32, %arg1: memref<8xi32, #tpu.memory_space<smem>>) -> (i32, i32) {
    %c0_i32 = arith.constant 0 : i32
    %c0_i32_0 = arith.constant 0 : i32
    %c0_i32_1 = arith.constant 0 : i32
    return %c0_i32, %c0_i32_0 : i32, i32
  }
  func.func @transform_4(%arg0: i32, %arg1: memref<8xi32, #tpu.memory_space<smem>>) -> (i32, i32) {
    %c0_i32 = arith.constant 0 : i32
    %c0_i32_0 = arith.constant 0 : i32
    %c0_i32_1 = arith.constant 0 : i32
    return %c0_i32, %c0_i32_0 : i32, i32
  }
  func.func @transform_5(%arg0: i32, %arg1: memref<8xi32, #tpu.memory_space<smem>>) -> (i32, i32) {
    %c0_i32 = arith.constant 0 : i32
    %c0_i32_0 = arith.constant 0 : i32
    return %arg0, %c0_i32 : i32, i32
  }
}

</mosaic_0001>

<bundles_post_ra>
// kernel: timestep_embedder.1
= control target key start
LH: loop header
LB: loop body
LE: loop exit
PB: predicated region body
PF: predicated region fallthrough
CT: control target
= control target key end

     0   :  { %s747_s21 = smov [#allocation5]   ;;  %s865_s0 = inlined_call_operand.hbm [shape: s32[8], index: 0, kind: input, shape index: {}]   ;;  %s866_s1 = inlined_call_operand.hbm [shape: f32[5000,1,128], index: 1, kind: input, shape index: {}]   ;;  %s867_s2 = inlined_call_operand.hbm [shape: bf16[128,128], index: 2, kind: input, shape index: {}]   ;;  %s868_s3 = inlined_call_operand.hbm [shape: f32[1,128], index: 3, kind: input, shape index: {}]   ;;  %s869_s4 = inlined_call_operand.hbm [shape: bf16[128,128], index: 4, kind: input, shape index: {}]   ;;  %s870_s5 = inlined_call_operand.hbm [shape: f32[1,128], index: 5, kind: input, shape index: {}]   ;;  %s871_s6 = inlined_call_operand.hbm [shape: f32[8,128], index: 6, kind: output, shape index: {}]  }
   0x1   :  { %12 = dma.hbm_to_smem %s865_s0, 16, %s747_s21, [#allocation4] }
   0x2   :  { %727 = dma.done.wait [#allocation4], 16 }
   0x3   :  { %728 = vsyncadd [#allocation4], 4294967280 }
   0x4   :  { %14 = sfence }
   0x5   :  { %15 = vsyncpa [#allocation7], 0 }
   0x6   :  { %16 = vsyncpa [#allocation10], 0 }
   0x7   :  { %17 = vsyncpa [#allocation13], 0 }
   0x8   :  { %18 = vsyncpa [#allocation8], 0  ;;  %s748_s24 = smov [#allocation9]   ;;  %s749_s26 = smov [#allocation6]  }
   0x9   :  { %s37_s25 = sshll.u32 %s748_s24, 4  ;;  %s24_s27 = sshll.u32 %s749_s26, 4  ;;  %s38_s25 = int_to_ptr.vmem [resolvable:$true] %s37_s25  ;;  %s25_s27 = int_to_ptr.vmem [resolvable:$true] %s24_s27 }
   0xa   :  { %s605_s28 = scalar_lea.vmem %s38_s25, 16  ;;  %s609_s29 = scalar_lea.vmem %s38_s25, 32 }
   0xb   :  { %p606_p0 = scmp.ne.s32.totalorder %s38_s25, %s605_s28  ;;  %p610_p1 = scmp.lt.s32.totalorder %s38_s25, %s38_s25 }
   0xc   :  { %p611_p2 = scmp.lt.s32.totalorder %s609_s29, %s605_s28 }
   0xe   :  { %p612_p3 = por %p611_p2, %p610_p1 }
  0x10   :  { %p613_p4 = pnand %p612_p3, %p606_p0 }
  0x12   :  { %616 = shalt.err (!%p613_p4)
}
  0x13   :  { %40 = dma.hbm_to_vmem [thread:$0]  %s868_s3, 16, %s38_s25, [#allocation10]  }
  0x14   :  { %s625_s7 = scalar_lea.vmem %s25_s27, 1024  ;;  %p630_p6 = scmp.lt.s32.totalorder %s25_s27, %s25_s27 }
  0x15   :  { %p626_p5 = scmp.ne.s32.totalorder %s25_s27, %s625_s7  ;;  %p631_p7 = scmp.lt.s32.totalorder %s625_s7, %s625_s7 }
  0x17   :  { %p632_p8 = por %p631_p7, %p630_p6 }
  0x19   :  { %p633_p9 = pnand %p632_p8, %p626_p5 }
  0x1b   :  { %636 = shalt.err (!%p633_p9)
}
  0x1c   :  { %s750_s8 = smov 64   ;;  %s751_s9 = smov 4  }
  0x1d   :  { %30 = dma.hbm_to_vmem [thread:$0]  %s867_s2, 1024, %s25_s27, [#allocation7], %s750_s8, %s750_s8, %s751_s9  }
  0x1e   :  { %s752_s12 = smov [#allocation11]   ;;  %s753_s14 = smov [#allocation12]  }
  0x1f   :  { %s46_s13 = sshll.u32 %s752_s12, 4  ;;  %s59_s15 = sshll.u32 %s753_s14, 4  ;;  %s47_s13 = int_to_ptr.vmem [resolvable:$true] %s46_s13  ;;  %s60_s15 = int_to_ptr.vmem [resolvable:$true] %s59_s15 }
  0x20   :  { %s645_s3 = scalar_lea.vmem %s47_s13, 1024  ;;  %p650_p11 = scmp.lt.s32.totalorder %s47_s13, %s47_s13 }
  0x21   :  { %p646_p10 = scmp.ne.s32.totalorder %s47_s13, %s645_s3  ;;  %p651_p12 = scmp.lt.s32.totalorder %s645_s3, %s645_s3 }
  0x23   :  { %p652_p13 = por %p651_p12, %p650_p11 }
  0x25   :  { %p653_p0 = pnand %p652_p13, %p646_p10 }
  0x27   :  { %656 = shalt.err (!%p653_p0)
}
  0x28   :  { %52 = dma.hbm_to_vmem [thread:$0]  %s869_s4, 1024, %s47_s13, [#allocation10], %s750_s8, %s750_s8, %s751_s9  }
  0x29   :  { %s665_s18 = scalar_lea.vmem %s60_s15, 16  ;;  %s669_s2 = scalar_lea.vmem %s60_s15, 32 }
  0x2a   :  { %p666_p1 = scmp.ne.s32.totalorder %s60_s15, %s665_s18  ;;  %p670_p2 = scmp.lt.s32.totalorder %s60_s15, %s60_s15 }
  0x2b   :  { %p671_p3 = scmp.lt.s32.totalorder %s669_s2, %s665_s18 }
  0x2d   :  { %p672_p4 = por %p671_p3, %p670_p2 }
  0x2f   :  { %p673_p5 = pnand %p672_p4, %p666_p1 }
  0x31   :  { %676 = shalt.err (!%p673_p5)
}
  0x32   :  { %62 = dma.hbm_to_vmem [thread:$0]  %s870_s5, 16, %s60_s15, [#allocation13]  }
  0x33   :  { %729 = dma.done.wait [#allocation7], 1024  }
  0x34   :  { %730 = vsyncadd [#allocation7], 4294966272 }
  0x35   :  { %731 = dma.done.wait [#allocation10], 1040  }
  0x36   :  { %732 = vsyncadd [#allocation10], 4294966256 }
  0x37   :  { %733 = dma.done.wait [#allocation13], 16  }
  0x38   :  { %734 = vsyncadd [#allocation13], 4294967280  ;;  %s808_s21 = smov 0  }
  0x39 LB: > { %p83_p6 = scmp.lt.s32.totalorder %s741_s21, 7  ;;  %s88_s5 = scalar_lea.vmem [#allocation2], %s741_s21  ;;  %s741_s21 = sphi %s808_s21, %s81_s21  }
  0x3a   : > { %s96_s23 = sshll.u32 %s88_s5, 4  ;;  %s679_s30 = scalar_lea.hbm %s866_s1, 80000  ;;  %s97_s23 = int_to_ptr.vmem [resolvable:$true] %s96_s23 }
  0x3b   : > { %s84_s4 = scalar_select %p83_p6, %s741_s21, 7 }
  0x3d   : > { %s85_s22 = sld [smem:[#allocation5 + %s84_s4]] }
  0x43   : > { %s372_s24 = sshll.u32 %s85_s22, 4 }
  0x44   : > { %s87_s27 = scalar_lea.hbm %s866_s1, %s372_s24 }
  0x45   : > { %s677_s28 = scalar_lea.hbm %s87_s27, 16  ;;  %p680_p8 = scmp.lt.s32.totalorder %s87_s27, %s866_s1 }
  0x46   : > { %p678_p7 = scmp.ne.s32.totalorder %s87_s27, %s677_s28  ;;  %p681_p9 = scmp.lt.s32.totalorder %s679_s30, %s677_s28 }
  0x48   : > { %p682_p10 = por %p681_p9, %p680_p8 }
  0x4a   : > { %p683_p11 = pnand %p682_p10, %p678_p7 }
  0x4c   : > { %686 = shalt.err (!%p683_p11)  }
  0x4d   : > { %s687_s9 = scalar_lea.vmem %s97_s23, 16  ;;  %s754_s10 = smov [#allocation2]  }
  0x4e   : > { %p688_p12 = scmp.ne.s32.totalorder %s97_s23, %s687_s9  ;;  %s689_s11 = sshll.u32 %s754_s10, 4  ;;  %s690_s11 = int_to_ptr.vmem [resolvable:$false] %s689_s11 }
  0x4f   : > { %s691_s12 = scalar_lea.vmem %s690_s11, 128  ;;  %p692_p13 = scmp.lt.s32.totalorder %s97_s23, %s690_s11 }
  0x50   : > { %p693_p0 = scmp.lt.s32.totalorder %s691_s12, %s687_s9 }
  0x52   : > { %p694_p1 = por %p693_p0, %p692_p13 }
  0x54   : > { %p695_p2 = pnand %p694_p1, %p688_p12 }
  0x56   : > { %698 = shalt.err (!%p695_p2)  }
  0x57   : > { %99 = dma.hbm_to_vmem [thread:$0]  %s87_s27, 16, %s97_s23, [#allocation3] }
  0x58   : > { %s81_s21 = sadd.s32 1, %s741_s21  }
  0x59   : > { %p78_p3 = scmp.ge.s32.totalorder %s81_s21, 8  }
  0x5a   :  { %s743_s13 = smov (%p78_p3), 0  }
  0x5b   :  { %80 = sbr.rel (!%p78_p3) target bundleno = 57 (0x39), region = 72 }
  0x60 LB: > { %735 = dma.done.wait [#allocation3], 16  ;;  %s745_s13 = sphi %s743_s13, %s105_s13  }
  0x61   : > { %736 = vsyncadd [#allocation3], 4294967280  ;;  %s105_s13 = sadd.s32 1, %s745_s13  }
  0x62   : > { %p102_p4 = scmp.ge.s32.totalorder %s105_s13, 8  }
  0x63   :  { %v447_v0 = vld [vmem:[#allocation6 + $0x38] sm:$0xff] (%p102_p4)   ;;  %v446_v1 = vld [vmem:[#allocation6 + $0x30] sm:$0xff] (%p102_p4)   ;;  %v755_v2 = vmov (%p102_p4), 0.0   ;;  %vm756_vm0 = vmmov (%p102_p4), 0   ;;  %v445_v6 = vld [vmem:[#allocation6 + $0x28] sm:$0xff] (%p102_p4)   ;;  %s757_s1 = smov (%p102_p4), [#allocation14]  }
  0x64   :  { %104 = sbr.rel (!%p102_p4) target bundleno = 96 (0x60), region = 83  ;;  %489 = vmatprep.subr.mxu0 (%p102_p4), %v755_v2  ;;  %v407_v3 = vunpack.c.l.bf16 (%p102_p4), %v447_v0  ;;  %v408_v4 = vunpack.c.h.bf16 (%p102_p4), %v447_v0  ;;  %521 = vmatprep.mubr.msk.f32.mxu0 (%p102_p4), %vm756_vm0, %v755_v2  ;;  %v404_v5 = vunpack.c.h.bf16 (%p102_p4), %v446_v1  ;;  %v403_v7 = vunpack.c.l.bf16 (%p102_p4), %v446_v1  ;;  %v444_v9 = vld [vmem:[#allocation6 + $0x20] sm:$0xff] (%p102_p4)   ;;  %v443_v12 = vld [vmem:[#allocation6 + $0x18] sm:$0xff] (%p102_p4)   ;;  %v442_v15 = vld [vmem:[#allocation6 + $0x10] sm:$0xff] (%p102_p4)   ;;  %s342_s14 = sshll.u32 (%p102_p4), %s757_s1, 4  ;;  %s343_s14 = int_to_ptr.vmem [resolvable:$true] %s342_s14 }
  0x65   :  { %524 = vmatprep.subr.mxu1 (%p102_p4), %v755_v2  ;;  %556 = vmatprep.mubr.msk.f32.mxu1 (%p102_p4), %vm756_vm0, %v755_v2  ;;  %v400_v8 = vunpack.c.h.bf16 (%p102_p4), %v445_v6  ;;  %v399_v10 = vunpack.c.l.bf16 (%p102_p4), %v445_v6  ;;  %v396_v11 = vunpack.c.h.bf16 (%p102_p4), %v444_v9  ;;  %v395_v13 = vunpack.c.l.bf16 (%p102_p4), %v444_v9  ;;  %v441_v18 = vld [vmem:[#allocation6 + $0x8] sm:$0xff] (%p102_p4)   ;;  %v378_v21 = vld [vmem:[#allocation6] sm:$0xff] (%p102_p4)   ;;  %v109_v25 = vld [vmem:[#allocation2] sm:$0xff] (%p102_p4)  ;;  %s699_s15 = scalar_lea.vmem (%p102_p4), %s343_s14, 128  ;;  %p704_p6 = scmp.lt.s32.totalorder (%p102_p4), %s343_s14, %s343_s14 }
  0x66   :  { %490 = vmatpush3.msra.mxu0 (%p102_p4), %v408_v4  ;;  %v392_v14 = vunpack.c.h.bf16 (%p102_p4), %v443_v12  ;;  %v391_v16 = vunpack.c.l.bf16 (%p102_p4), %v443_v12  ;;  %v388_v17 = vunpack.c.h.bf16 (%p102_p4), %v442_v15  ;;  %v387_v19 = vunpack.c.l.bf16 (%p102_p4), %v442_v15  ;;  %v454_v26 = vld [vmem:[#allocation11 + $0x38] sm:$0xff] (%p102_p4)   ;;  %v453_v29 = vld [vmem:[#allocation11 + $0x30] sm:$0xff] (%p102_p4)   ;;  %v452_v32 = vld [vmem:[#allocation11 + $0x28] sm:$0xff] (%p102_p4)   ;;  %p700_p5 = scmp.ne.s32.totalorder (%p102_p4), %s343_s14, %s699_s15  ;;  %p705_p7 = scmp.lt.s32.totalorder (%p102_p4), %s699_s15, %s699_s15 }
  0x67   :  { %491 = vmatprep.subr.mxu0 (%p102_p4), %v755_v2  ;;  %v384_v20 = vunpack.c.h.bf16 (%p102_p4), %v441_v18  ;;  %v383_v22 = vunpack.c.l.bf16 (%p102_p4), %v441_v18  ;;  %v380_v23 = vunpack.c.h.bf16 (%p102_p4), %v378_v21  ;;  %v379_v24 = vunpack.c.l.bf16 (%p102_p4), %v378_v21  ;;  %v451_v35 = vld [vmem:[#allocation11 + $0x20] sm:$0xff] (%p102_p4)   ;;  %v450_v38 = vld [vmem:[#allocation11 + $0x18] sm:$0xff] (%p102_p4)   ;;  %v449_v41 = vld [vmem:[#allocation11 + $0x10] sm:$0xff] (%p102_p4)  }
  0x68   :  { %492 = vmatpush3.msra.mxu0 (%p102_p4), %v407_v3  ;;  %v440_v27 = vunpack.c.h.bf16 (%p102_p4), %v454_v26  ;;  %v439_v28 = vunpack.c.l.bf16 (%p102_p4), %v454_v26  ;;  %v436_v30 = vunpack.c.h.bf16 (%p102_p4), %v453_v29  ;;  %v435_v31 = vunpack.c.l.bf16 (%p102_p4), %v453_v29  ;;  %v448_v44 = vld [vmem:[#allocation11 + $0x8] sm:$0xff] (%p102_p4)   ;;  %v410_v47 = vld [vmem:[#allocation11] sm:$0xff] (%p102_p4)   ;;  %v373_v50 = vld [vmem:[#allocation9] ss:$0 sm:$0xff] (%p102_p4)  ;;  %p706_p8 = por (%p102_p4), %p705_p7, %p704_p6 }
  0x69   :  { %493 = vmatprep.subr.mxu0 %v755_v2  ;;  %v432_v33 = vunpack.c.h.bf16 %v452_v32  ;;  %v431_v34 = vunpack.c.l.bf16 %v452_v32  ;;  %v428_v36 = vunpack.c.h.bf16 %v451_v35  ;;  %v427_v37 = vunpack.c.l.bf16 %v451_v35  ;;  %v375_v59 = vld [vmem:[#allocation12] ss:$0 sm:$0xff] }
  0x6a   :  { %494 = vmatpush3.msra.mxu0 %v404_v5  ;;  %525 = vmatpush3.msra.mxu1 %v440_v27  ;;  %v424_v39 = vunpack.c.h.bf16 %v450_v38  ;;  %v423_v40 = vunpack.c.l.bf16 %v450_v38  ;;  %v420_v42 = vunpack.c.h.bf16 %v449_v41  ;;  %v419_v43 = vunpack.c.l.bf16 %v449_v41  ;;  %p707_p9 = pnand %p706_p8, %p700_p5 }
  0x6b   :  { %495 = vmatprep.subr.mxu0 %v755_v2  ;;  %526 = vmatprep.subr.mxu1 %v755_v2  ;;  %v416_v45 = vunpack.c.h.bf16 %v448_v44  ;;  %v415_v46 = vunpack.c.l.bf16 %v448_v44  ;;  %v412_v48 = vunpack.c.h.bf16 %v410_v47  ;;  %v411_v49 = vunpack.c.l.bf16 %v410_v47 }
  0x6c   :  { %496 = vmatpush3.msra.mxu0 %v403_v7  ;;  %527 = vmatpush3.msra.mxu1 %v439_v28 }
  0x6d   :  { %497 = vmatprep.subr.mxu0 %v755_v2  ;;  %528 = vmatprep.subr.mxu1 %v755_v2 }
  0x6e   :  { %498 = vmatpush3.msra.mxu0 %v400_v8  ;;  %529 = vmatpush3.msra.mxu1 %v436_v30 }
  0x6f   :  { %499 = vmatprep.subr.mxu0 %v755_v2  ;;  %530 = vmatprep.subr.mxu1 %v755_v2 }
  0x70   :  { %500 = vmatpush3.msra.mxu0 %v399_v10  ;;  %531 = vmatpush3.msra.mxu1 %v435_v31 }
  0x71   :  { %501 = vmatprep.subr.mxu0 %v755_v2  ;;  %532 = vmatprep.subr.mxu1 %v755_v2 }
  0x72   :  { %502 = vmatpush3.msra.mxu0 %v396_v11  ;;  %533 = vmatpush3.msra.mxu1 %v432_v33 }
  0x73   :  { %503 = vmatprep.subr.mxu0 %v755_v2  ;;  %534 = vmatprep.subr.mxu1 %v755_v2 }
  0x74   :  { %504 = vmatpush3.msra.mxu0 %v395_v13  ;;  %535 = vmatpush3.msra.mxu1 %v431_v34 }
  0x75   :  { %505 = vmatprep.subr.mxu0 %v755_v2  ;;  %536 = vmatprep.subr.mxu1 %v755_v2 }
  0x76   :  { %506 = vmatpush3.msra.mxu0 %v392_v14  ;;  %537 = vmatpush3.msra.mxu1 %v428_v36 }
  0x77   :  { %507 = vmatprep.subr.mxu0 %v755_v2  ;;  %538 = vmatprep.subr.mxu1 %v755_v2 }
  0x78   :  { %508 = vmatpush3.msra.mxu0 %v391_v16  ;;  %539 = vmatpush3.msra.mxu1 %v427_v37 }
  0x79   :  { %509 = vmatprep.subr.mxu0 %v755_v2  ;;  %540 = vmatprep.subr.mxu1 %v755_v2 }
  0x7a   :  { %510 = vmatpush3.msra.mxu0 %v388_v17  ;;  %541 = vmatpush3.msra.mxu1 %v424_v39 }
  0x7b   :  { %511 = vmatprep.subr.mxu0 %v755_v2  ;;  %542 = vmatprep.subr.mxu1 %v755_v2 }
  0x7c   :  { %512 = vmatpush3.msra.mxu0 %v387_v19  ;;  %543 = vmatpush3.msra.mxu1 %v423_v40 }
  0x7d   :  { %513 = vmatprep.subr.mxu0 %v755_v2  ;;  %544 = vmatprep.subr.mxu1 %v755_v2 }
  0x7e   :  { %514 = vmatpush3.msra.mxu0 %v384_v20  ;;  %545 = vmatpush3.msra.mxu1 %v420_v42 }
  0x7f   :  { %515 = vmatprep.subr.mxu0 %v755_v2  ;;  %546 = vmatprep.subr.mxu1 %v755_v2 }
  0x80   :  { %516 = vmatpush3.msra.mxu0 %v383_v22  ;;  %547 = vmatpush3.msra.mxu1 %v419_v43 }
  0x81   :  { %517 = vmatprep.subr.mxu0 %v755_v2  ;;  %548 = vmatprep.subr.mxu1 %v755_v2 }
  0x82   :  { %518 = vmatpush3.msra.mxu0 %v380_v23  ;;  %549 = vmatpush3.msra.mxu1 %v416_v45 }
  0x83   :  { %519 = vmatprep.subr.mxu0 %v755_v2  ;;  %550 = vmatprep.subr.mxu1 %v755_v2 }
  0x84   :  { %520 = vmatpush3.msra.mxu0 %v379_v24  ;;  %551 = vmatpush3.msra.mxu1 %v415_v46 }
  0x85   :  { %522 = vmatmul.mubr.f32.vlgmr.msra.gmra.mxu0 %v109_v25  ;;  %552 = vmatprep.subr.mxu1 %v755_v2 }
  0x86   :  { %553 = vmatpush3.msra.mxu1 %v412_v48 }
  0x87   :  { %554 = vmatprep.subr.mxu1 %v755_v2 }
  0x88   :  { %555 = vmatpush3.msra.mxu1 %v411_v49 }
 0x145   :  { %v215_v51 = vpop.f32.mrf.mxu0 }
 0x146   :  { %v216_v52 = vadd.f32 %v373_v50, %v215_v51 }
 0x147   :  { %v523_v53 = vpop.f32.mrf.mxu0 }
 0x148   :  { %v374_v54 = vmul.f32 -1.442695, %v216_v52 }
 0x14a   :  { %585 = vpow2.f32 %v374_v54 }
 0x157   :  { %v586_v55 = vpop.eup %585 }
 0x158   :  { %v222_v56 = vadd.f32 1.0, %v586_v55 }
 0x15a   :  { %587 = vrcp.f32 %v222_v56 }
 0x167   :  { %v588_v57 = vpop.eup %587 }
 0x168   :  { %v225_v58 = vmul.f32 %v588_v57, %v216_v52 }
 0x16a   :  { %557 = vmatmul.mubr.f32.vlgmr.msra.gmra.mxu1 %v225_v58 }
 0x22a   :  { %v331_v60 = vpop.f32.mrf.mxu1 }
 0x22b   :  { %v332_v61 = vadd.f32 %v375_v59, %v331_v60 }
 0x22c   :  { %v558_v62 = vpop.f32.mrf.mxu1 }
 0x22d   :  { %335 = vst [vmem:[#allocation14] sm:$0xff] %v332_v61 }
 0x22e   :  { %710 = shalt.err (!%p707_p9)
}
 0x22f   :  { %345 = dma.vmem_to_hbm [thread:$0]  %s343_s14, 128, %s871_s6, [#allocation8]  }
 0x230   :  { %737 = dma.done.wait [#allocation8], 128  }
 0x231   :  { %738 = vsyncadd [#allocation8], 4294967168 }
 0x232   :  { %349 = vsyncpa [#allocation7], 1 }
 0x233   :  { %350 = vsyncpa [#allocation10], 1 }
 0x234   :  { %351 = vsyncpa [#allocation13], 1 }
 0x235   :  { %352 = vsyncpa [#allocation8], 1 }
 0x236   :  { %353 = vsyncmov [#allocation3] }
 0x239   :  { %s354_s17 = vpop.sfrf %353 }
 0x23a   :  { %p376_p10 = scmp.ne.s32.totalorder %s354_s17, 0 }
 0x23c   :  { %358 = shalt.err (%p376_p10)  }

</bundles_post_ra>
